<compile_context>
chip_gen: v7x
topology: tpu7x:2x2x1
jax: 0.10.0
libtpu: 0.0.40
codegen_flags: <defaults>
</compile_context>

<pallas_src>
import functools

import jax
import jax.numpy as jnp
from jax.experimental import pallas as pl
from jax.experimental.pallas import tpu as pltpu


# ----------------------------- configuration -------------------------------
NUM_FREQS = 8          # F
MIN_FREQ_LOG2 = 0.0
MAX_FREQ_LOG2 = None   # -> F - 1
SCALE = 1.0
USE_IDENTITY = True
C_IN = 1               # time is a scalar per sample
MLP_WIDTH = 32         # mlp_args = dict(depth=2, width=32, output_channels=8)
MLP_OUT = 8
TILE_M_DEFAULT = 16384  # lanes per grid step (fits comfortably on v5e/v6e/v7x)
EXTRA_ROWS = 8          # sublane-aligned block carrying [x, 1, 0, ...] rows


# ------------------------------ Pallas kernel ------------------------------
def time_encoder_kernel(x_ref,      # [1, TILE_M]     time samples (lane-dense)
                        fp_ref,     # [2F+8, 2]       (scale*freq, phase) + selector rows
                        w0p_ref,    # [W, 2F+8] bf16  packed layer-0 weight (win folded)
                        w1_ref,     # [W, W]    bf16
                        b1_ref,     # [W, 1]    f32
                        wo_ref,     # [OUT, W]  bf16
                        bo_ref,     # [OUT, 1]  f32
                        o_ref):     # [OUT, TILE_M]   f32
    x = x_ref[...]                                       # [1, TM]
    fp = fp_ref[...]                                     # [2F+8, 2]
    k0 = fp.shape[0] - EXTRA_ROWS                        # 2F sinusoid rows

    # Sinusoidal features on the VPU: rows 0..F-1 sin, rows F..2F-1 cos.
    freq, phase = fp[:k0, 0:1], fp[:k0, 1:2]
    ang = freq * x + phase                               # [2F, TM]

    # Identity / bias rows built from selector columns (row 2F = x, 2F+1 = 1,
    # remaining rows 0) -> sublane-aligned concat, no outer-product broadcast.
    sel_x, sel_1 = fp[k0:, 0:1], fp[k0:, 1:2]            # [8, 1] each
    extra = sel_x * x + sel_1                            # [8, TM]

    feats = jnp.concatenate([jnp.sin(ang), extra], axis=0)   # [2F+8, TM] f32
    feats = feats.astype(jnp.bfloat16)

    # Layer 0 (identity, features, window and bias all folded into one matmul).
    h = jnp.dot(w0p_ref[...], feats, preferred_element_type=jnp.float32)
    h = jnp.maximum(h, 0.0)                              # [W, TM]

    # Layer 1
    h = jnp.dot(w1_ref[...], h.astype(jnp.bfloat16),
                preferred_element_type=jnp.float32) + b1_ref[...]
    h = jnp.maximum(h, 0.0)

    # Output layer (kept f32; see TODO about bf16 output).
    o_ref[...] = (jnp.dot(wo_ref[...], h.astype(jnp.bfloat16),
                          preferred_element_type=jnp.float32) + bo_ref[...])


# ------------------------------ host helpers -------------------------------
def _round_up(x, m):
    return (x + m - 1) // m * m


def cosine_easing_window(min_freq_log2, max_freq_log2, num_bands, alpha):
    if max_freq_log2 is None:
        max_freq_log2 = num_bands - 1.0
    bands = jnp.linspace(min_freq_log2, max_freq_log2, num_bands)
    xw = jnp.clip(alpha - bands, 0.0, 1.0)
    return 0.5 * (1.0 + jnp.cos(jnp.pi * xw + jnp.pi))


def init_mlp_params(key, d_in_id, d_in_feat, width, d_out):
    ks = jax.random.split(key, 7)
    scale0 = 1.0 / jnp.sqrt(d_in_id + d_in_feat)
    w0_id = jax.random.normal(ks[0], (d_in_id, width), jnp.float32) * scale0
    w0_feat = jax.random.normal(ks[1], (d_in_feat, width), jnp.float32) * scale0
    b0 = jax.random.normal(ks[2], (1, width), jnp.float32) * 0.05
    w1 = jax.random.normal(ks[3], (width, width), jnp.float32) / jnp.sqrt(width)
    b1 = jax.random.normal(ks[4], (1, width), jnp.float32) * 0.05
    # nn.init.uniform(..., a=0.05)  ->  U(0.05, 1.0) on the output layer
    wo = jax.random.uniform(ks[5], (width, d_out), jnp.float32, 0.05, 1.0)
    bo = jax.random.normal(ks[6], (1, d_out), jnp.float32) * 0.05
    return w0_id, w0_feat, b0, w1, b1, wo, bo


def build_kernel_params(freqs, window, scale, w0i, w0f, b0, w1, b1, wo, bo):
    """Fold window/scale into weights, pack constants, cast MXU operands to bf16."""
    F = freqs.shape[0]
    W = w1.shape[0]
    OUT = wo.shape[1]

    # torch window indexing is literal: feature j (interleaved, j = 2f + s)
    # gets window[j % F] (window[None,None,:].repeat(1,1,2)).
    win_tiled = jnp.tile(window, 2)                        # [2F]
    w0f_win = win_tiled[:, None] * w0f                     # [2F, W]
    w0_sin = w0f_win[0::2, :]                              # [F, W]  (features 2f)
    w0_cos = w0f_win[1::2, :]                              # [F, W]  (features 2f+1)

    # Packed layer-0 weight columns: [sin f0..fF-1 | cos f0..fF-1 | x | 1 | 0*6]
    zeros = jnp.zeros((EXTRA_ROWS - 2, W), jnp.float32)
    w0p = jnp.concatenate([w0_sin, w0_cos, w0i, b0, zeros], axis=0).T   # [W, 2F+8]

    # fp: rows 0..2F-1 = (scale*freq, phase); rows 2F.. = selector one-hots.
    freq_col = (scale * jnp.concatenate([freqs, freqs]))[:, None]
    phase_col = jnp.concatenate([jnp.zeros((F,), jnp.float32),
                                 jnp.full((F,), jnp.pi / 2, jnp.float32)])[:, None]
    sel = jnp.zeros((EXTRA_ROWS, 2), jnp.float32)
    sel = sel.at[0, 0].set(1.0)      # row 2F     -> x (identity input)
    sel = sel.at[1, 1].set(1.0)      # row 2F + 1 -> 1 (layer-0 bias input)
    fp = jnp.concatenate(
        [jnp.concatenate([freq_col, phase_col], axis=1), sel], axis=0)  # [2F+8, 2]

    return (fp.astype(jnp.float32),
            w0p.astype(jnp.bfloat16),
            w1.T.astype(jnp.bfloat16),
            b1.reshape(W, 1).astype(jnp.float32),
            wo.T.astype(jnp.bfloat16),
            bo.reshape(OUT, 1).astype(jnp.float32))


# ------------------------------ host wrapper -------------------------------
@functools.partial(jax.jit, static_argnames=("out_ch", "tile_m", "transpose_output"))
def time_encoder_pallas(time_bnc, fp, w0p, w1_t, b1_col, wo_t, bo_col, *,
                        out_ch, tile_m=TILE_M_DEFAULT, transpose_output=True):
    B, N, C = time_bnc.shape
    assert C == 1, "TimeEncoder consumes a scalar time per sample"
    M = B * N
    W = w1_t.shape[0]
    K0 = fp.shape[0]                       # 2F + EXTRA_ROWS

    # Pad only to the 128-lane granule, then size the tile so the last block
    # is (nearly) full.  Force >= 2 grid steps when there is enough work so
    # v7x's second TensorCore gets a share of the "parallel" grid axis.
    m_pad = _round_up(M, 128)
    n_steps = max(pl.cdiv(m_pad, tile_m), 2 if m_pad >= 256 else 1)
    tm = _round_up(pl.cdiv(m_pad, n_steps), 128)
    m_pad = n_steps * tm

    x = time_bnc.reshape(M).astype(jnp.float32)
    x = jnp.pad(x, (0, m_pad - M)).reshape(1, m_pad)       # [1, M_pad] lane-dense

    def const_spec(arr):
        return pl.BlockSpec(arr.shape, lambda i: (0, 0))

    cost = pl.CostEstimate(
        flops=2 * m_pad * (W * K0 + W * W + out_ch * W),
        transcendentals=(K0 - EXTRA_ROWS) * m_pad,
        bytes_accessed=4 * m_pad * (1 + out_ch),
    )
    vmem_limit = (32 if tm <= 16384 else 64) * 1024 * 1024

    out = pl.pallas_call(
        time_encoder_kernel,
        out_shape=jax.ShapeDtypeStruct((out_ch, m_pad), jnp.float32),
        grid_spec=pltpu.PrefetchScalarGridSpec(
            num_scalar_prefetch=0,
            grid=(n_steps,),
            in_specs=[
                pl.BlockSpec((1, tm), lambda i: (0, i)),   # x (streamed)
                const_spec(fp),
                const_spec(w0p),
                const_spec(w1_t),
                const_spec(b1_col),
                const_spec(wo_t),
                const_spec(bo_col),
            ],
            out_specs=pl.BlockSpec((out_ch, tm), lambda i: (0, i)),
        ),
        compiler_params=pltpu.CompilerParams(
            dimension_semantics=("parallel",),
            vmem_limit_bytes=vmem_limit),
        cost_estimate=cost,
    )(x, fp, w0p, w1_t, b1_col, wo_t, bo_col)

    out = out[:, :M]                                       # [OUT, M]
    if transpose_output:
        return out.T.reshape(B, N, out_ch)                 # module layout [B, N, OUT]
    # Transpose-free layout for fused consumers (avoids an extra HBM pass).
    return out.reshape(out_ch, B, N)


# ----------------------------- pure-JAX reference ---------------------------
def reference_forward(time_bnc, freqs, window, scale, w0i, w0f, b0, w1, b1, wo, bo):
    x = time_bnc.astype(jnp.float32)                          # [B, N, C]
    x_exp = x[..., None, :]                                   # [B, N, 1, C]
    angles = scale * x_exp * freqs[:, None]                   # [B, N, F, C]
    feats = jnp.stack([angles, angles + jnp.pi / 2], axis=-2)  # [B, N, F, 2, C]
    feats = feats.reshape(*x.shape[:-1], -1)                  # [B, N, 2FC]
    feats = jnp.sin(feats)
    win_tiled = jnp.tile(window, 2 * C_IN)                    # window[j % F]
    feats = win_tiled[None, None, :] * feats                  # annealing window
    h = jax.nn.relu(x @ w0i + feats @ w0f + b0)               # identity concat (split W)
    h = jax.nn.relu(h @ w1 + b1)
    return h @ wo + bo


# ---------------------------------- main ------------------------------------
if __name__ == "__main__":
    key = jax.random.PRNGKey(0)
    k_time, k_mlp = jax.random.split(key)

    B, N = 2, 8
    time = jax.random.uniform(k_time, (B, N, C_IN), jnp.float32)   # [2, 8, 1]

    max_f = (NUM_FREQS - 1.0) if MAX_FREQ_LOG2 is None else MAX_FREQ_LOG2
    freqs = 2.0 ** jnp.linspace(MIN_FREQ_LOG2, max_f, NUM_FREQS)   # [F]

    n_feat = 2 * NUM_FREQS * C_IN
    w0i, w0f, b0, w1, b1, wo, bo = init_mlp_params(
        k_mlp, C_IN, n_feat, MLP_WIDTH, MLP_OUT)

    # Check at the module default alpha (window == 1) and at a non-trivial
    # alpha (window < 1) so the folded annealing window is exercised.
    for alpha in (float(NUM_FREQS), 3.5):
        window = cosine_easing_window(MIN_FREQ_LOG2, MAX_FREQ_LOG2, NUM_FREQS, alpha)
        kparams = build_kernel_params(freqs, window, SCALE,
                                      w0i, w0f, b0, w1, b1, wo, bo)
        out = time_encoder_pallas(time, *kparams, out_ch=MLP_OUT)
        out = jax.block_until_ready(out)

        ref = reference_forward(time, freqs, window, SCALE,
                                w0i, w0f, b0, w1, b1, wo, bo)
        assert out.shape == (B, N, MLP_OUT)
        err = float(jnp.max(jnp.abs(out - ref)))
        # Tolerance accounts for bf16 MXU operands (f32 accumulation).
        assert jnp.allclose(out, ref, atol=5e-2, rtol=2e-2), (
            f"alpha={alpha}: max abs err {err}")

    print("KERNEL_OK")
</pallas_src>

<mosaic_0001>
module attributes {stable_mosaic.version = 11 : i64} {
  func.func @time_encoder_kernel(%arg0: i32, %arg1: memref<1x128xf32, #tpu.memory_space<vmem>>, %arg2: memref<24x2xf32, #tpu.memory_space<vmem>>, %arg3: memref<32x24xbf16, #tpu.memory_space<vmem>>, %arg4: memref<32x32xbf16, #tpu.memory_space<vmem>>, %arg5: memref<32x1xf32, #tpu.memory_space<vmem>>, %arg6: memref<8x32xbf16, #tpu.memory_space<vmem>>, %arg7: memref<8x1xf32, #tpu.memory_space<vmem>>, %arg8: memref<8x128xf32, #tpu.memory_space<vmem>>) attributes {dimension_semantics = [#tpu.dimension_semantics<parallel>], iteration_bounds = array<i64: 1>, scalar_prefetch = 0 : i64, scratch_operands = 0 : i64, tpu.core_type = #tpu.core_type<tc>, window_params = [{transform_indices = @transform_0, window_bounds = array<i64: 1, 128>}, {pipeline_mode = #tpu.pipeline_mode<synchronous>, transform_indices = @transform_1, window_bounds = array<i64: 24, 2>}, {pipeline_mode = #tpu.pipeline_mode<synchronous>, transform_indices = @transform_2, window_bounds = array<i64: 32, 24>}, {pipeline_mode = #tpu.pipeline_mode<synchronous>, transform_indices = @transform_3, window_bounds = array<i64: 32, 32>}, {pipeline_mode = #tpu.pipeline_mode<synchronous>, transform_indices = @transform_4, window_bounds = array<i64: 32, 1>}, {pipeline_mode = #tpu.pipeline_mode<synchronous>, transform_indices = @transform_5, window_bounds = array<i64: 8, 32>}, {pipeline_mode = #tpu.pipeline_mode<synchronous>, transform_indices = @transform_6, window_bounds = array<i64: 8, 1>}, {transform_indices = @transform_7, window_bounds = array<i64: 8, 128>}]} {
    %c0 = arith.constant 0 : index
    %c0_0 = arith.constant 0 : index
    %0 = vector.load %arg1[%c0, %c0_0] : memref<1x128xf32, #tpu.memory_space<vmem>>, vector<1x128xf32>
    %c0_1 = arith.constant 0 : index
    %c0_2 = arith.constant 0 : index
    %1 = vector.load %arg2[%c0_1, %c0_2] : memref<24x2xf32, #tpu.memory_space<vmem>>, vector<24x2xf32>
    %2 = vector.extract_strided_slice %1 {offsets = [0, 0], sizes = [16, 1], strides = [1, 1]} : vector<24x2xf32> to vector<16x1xf32>
    %3 = vector.extract_strided_slice %1 {offsets = [0, 1], sizes = [16, 1], strides = [1, 1]} : vector<24x2xf32> to vector<16x1xf32>
    %4 = vector.broadcast %2 : vector<16x1xf32> to vector<16x128xf32>
    %5 = vector.broadcast %0 : vector<1x128xf32> to vector<16x128xf32>
    %6 = arith.mulf %4, %5 : vector<16x128xf32>
    %7 = vector.broadcast %3 : vector<16x1xf32> to vector<16x128xf32>
    %8 = arith.addf %6, %7 : vector<16x128xf32>
    %9 = vector.extract_strided_slice %1 {offsets = [16, 0], sizes = [8, 1], strides = [1, 1]} : vector<24x2xf32> to vector<8x1xf32>
    %10 = vector.extract_strided_slice %1 {offsets = [16, 1], sizes = [8, 1], strides = [1, 1]} : vector<24x2xf32> to vector<8x1xf32>
    %11 = vector.broadcast %9 : vector<8x1xf32> to vector<8x128xf32>
    %12 = vector.broadcast %0 : vector<1x128xf32> to vector<8x128xf32>
    %13 = arith.mulf %11, %12 : vector<8x128xf32>
    %14 = vector.broadcast %10 : vector<8x1xf32> to vector<8x128xf32>
    %15 = arith.addf %13, %14 : vector<8x128xf32>
    %16 = math.sin %8 : vector<16x128xf32>
    %17 = tpu.concatenate %16, %15 in 0 : vector<16x128xf32>, vector<8x128xf32> -> vector<24x128xf32>
    %18 = arith.truncf %17 : vector<24x128xf32> to vector<24x128xbf16>
    %c0_3 = arith.constant 0 : index
    %c0_4 = arith.constant 0 : index
    %19 = vector.load %arg3[%c0_3, %c0_4] : memref<32x24xbf16, #tpu.memory_space<vmem>>, vector<32x24xbf16>
    %cst = arith.constant dense<0.000000e+00> : vector<32x128xf32>
    %20 = tpu.matmul %19, %18, %cst {dimension_numbers = #tpu.dot_dimension_numbers<[1], [0], [0], [1], [0, 0, 1, 1], [], []>} : vector<32x24xbf16>, vector<24x128xbf16>, vector<32x128xf32> -> vector<32x128xf32>
    %cst_5 = arith.constant 0.000000e+00 : f32
    %21 = vector.broadcast %cst_5 : f32 to vector<32x128xf32>
    %22 = arith.maximumf %20, %21 : vector<32x128xf32>
    %c0_6 = arith.constant 0 : index
    %c0_7 = arith.constant 0 : index
    %23 = vector.load %arg4[%c0_6, %c0_7] : memref<32x32xbf16, #tpu.memory_space<vmem>>, vector<32x32xbf16>
    %24 = arith.truncf %22 : vector<32x128xf32> to vector<32x128xbf16>
    %cst_8 = arith.constant dense<0.000000e+00> : vector<32x128xf32>
    %25 = tpu.matmul %23, %24, %cst_8 {dimension_numbers = #tpu.dot_dimension_numbers<[1], [0], [0], [1], [0, 0, 1, 1], [], []>} : vector<32x32xbf16>, vector<32x128xbf16>, vector<32x128xf32> -> vector<32x128xf32>
    %c0_9 = arith.constant 0 : index
    %c0_10 = arith.constant 0 : index
    %26 = vector.load %arg5[%c0_9, %c0_10] : memref<32x1xf32, #tpu.memory_space<vmem>>, vector<32x1xf32>
    %27 = vector.broadcast %26 : vector<32x1xf32> to vector<32x128xf32>
    %28 = arith.addf %25, %27 : vector<32x128xf32>
    %cst_11 = arith.constant 0.000000e+00 : f32
    %29 = vector.broadcast %cst_11 : f32 to vector<32x128xf32>
    %30 = arith.maximumf %28, %29 : vector<32x128xf32>
    %c0_12 = arith.constant 0 : index
    %c0_13 = arith.constant 0 : index
    %31 = vector.load %arg6[%c0_12, %c0_13] : memref<8x32xbf16, #tpu.memory_space<vmem>>, vector<8x32xbf16>
    %32 = arith.truncf %30 : vector<32x128xf32> to vector<32x128xbf16>
    %cst_14 = arith.constant dense<0.000000e+00> : vector<8x128xf32>
    %33 = tpu.matmul %31, %32, %cst_14 {dimension_numbers = #tpu.dot_dimension_numbers<[1], [0], [0], [1], [0, 0, 1, 1], [], []>} : vector<8x32xbf16>, vector<32x128xbf16>, vector<8x128xf32> -> vector<8x128xf32>
    %c0_15 = arith.constant 0 : index
    %c0_16 = arith.constant 0 : index
    %34 = vector.load %arg7[%c0_15, %c0_16] : memref<8x1xf32, #tpu.memory_space<vmem>>, vector<8x1xf32>
    %35 = vector.broadcast %34 : vector<8x1xf32> to vector<8x128xf32>
    %36 = arith.addf %33, %35 : vector<8x128xf32>
    %c0_17 = arith.constant 0 : index
    %c0_18 = arith.constant 0 : index
    %37 = vector.load %arg8[%c0_17, %c0_18] : memref<8x128xf32, #tpu.memory_space<vmem>>, vector<8x128xf32>
    tpu.vector_store %arg8[%c0_17, %c0_18], %36 {strides = array<i32>} : memref<8x128xf32, #tpu.memory_space<vmem>>, vector<8x128xf32>,
    return
  }
  func.func @transform_0(%arg0: i32) -> (i32, i32) {
    %c0_i32 = arith.constant 0 : i32
    %c0_i32_0 = arith.constant 0 : i32
    return %c0_i32, %arg0 : i32, i32
  }
  func.func @transform_1(%arg0: i32) -> (i32, i32) {
    %c0_i32 = arith.constant 0 : i32
    %c0_i32_0 = arith.constant 0 : i32
    %c0_i32_1 = arith.constant 0 : i32
    return %c0_i32, %c0_i32_0 : i32, i32
  }
  func.func @transform_2(%arg0: i32) -> (i32, i32) {
    %c0_i32 = arith.constant 0 : i32
    %c0_i32_0 = arith.constant 0 : i32
    %c0_i32_1 = arith.constant 0 : i32
    return %c0_i32, %c0_i32_0 : i32, i32
  }
  func.func @transform_3(%arg0: i32) -> (i32, i32) {
    %c0_i32 = arith.constant 0 : i32
    %c0_i32_0 = arith.constant 0 : i32
    %c0_i32_1 = arith.constant 0 : i32
    return %c0_i32, %c0_i32_0 : i32, i32
  }
  func.func @transform_4(%arg0: i32) -> (i32, i32) {
    %c0_i32 = arith.constant 0 : i32
    %c0_i32_0 = arith.constant 0 : i32
    %c0_i32_1 = arith.constant 0 : i32
    return %c0_i32, %c0_i32_0 : i32, i32
  }
  func.func @transform_5(%arg0: i32) -> (i32, i32) {
    %c0_i32 = arith.constant 0 : i32
    %c0_i32_0 = arith.constant 0 : i32
    %c0_i32_1 = arith.constant 0 : i32
    return %c0_i32, %c0_i32_0 : i32, i32
  }
  func.func @transform_6(%arg0: i32) -> (i32, i32) {
    %c0_i32 = arith.constant 0 : i32
    %c0_i32_0 = arith.constant 0 : i32
    %c0_i32_1 = arith.constant 0 : i32
    return %c0_i32, %c0_i32_0 : i32, i32
  }
  func.func @transform_7(%arg0: i32) -> (i32, i32) {
    %c0_i32 = arith.constant 0 : i32
    %c0_i32_0 = arith.constant 0 : i32
    return %c0_i32, %arg0 : i32, i32
  }
}

</mosaic_0001>

<bundles_post_ra>
// kernel: time_encoder_pallas.1
= control target key start
LH: loop header
LB: loop body
LE: loop exit
PB: predicated region body
PF: predicated region fallthrough
CT: control target
= control target key end

     0   :  { %v602_v0 = vmov 1   ;;  %v603_v1 = vmov 0   ;;  %vm294_vm0 = vcmask 195584   ;;  %v604_v36 = vmov 2102212464   ;;  %s800_s1 = inlined_call_operand.vmem [shape: f32[24,2], index: 1, kind: input, shape index: {}]   ;;  %s801_s4 = inlined_call_operand.vmem [shape: f32[32,1], index: 4, kind: input, shape index: {}]   ;;  %s802_s6 = inlined_call_operand.vmem [shape: f32[8,1], index: 6, kind: input, shape index: {}]   ;;  %s803_s2 = inlined_call_operand.vmem [shape: bf16[32,24], index: 2, kind: input, shape index: {}]   ;;  %s804_s0 = inlined_call_operand.vmem [shape: f32[1,128], index: 0, kind: input, shape index: {}]   ;;  %s805_s3 = inlined_call_operand.vmem [shape: bf16[32,32], index: 3, kind: input, shape index: {}]   ;;  %s806_s5 = inlined_call_operand.vmem [shape: bf16[8,32], index: 5, kind: input, shape index: {}]   ;;  %s807_s7 = inlined_call_operand.vmem [shape: f32[8,128], index: 7, kind: output, shape index: {}]  }
   0x1   :  { %588 = vset.pattern.permute.xlu1 %v602_v0  ;;  %587 = vset.pattern.permute.xlu0 %v603_v1  ;;  %v28_v2 = vld [vmem:[%s800_s1] sm:$0xff]  ;;  %v29_v3 = vld [vmem:[%s800_s1 + $0x8] sm:$0xff]  ;;  %v30_v4 = vld [vmem:[%s800_s1 + $0x10] sm:$0xff]  ;;  %v605_v38 = vmov 920167782  }
   0x2   :  { %50 = vperm.xlu1 %588, %v28_v2   ;;  %33 = vperm.xlu0 %587, %v28_v2   ;;  %v364_v5 = vld [vmem:[%s801_s4] sm:$0xff]  ;;  %v366_v6 = vld [vmem:[%s801_s4 + $0x10] sm:$0xff]  ;;  %v606_v42 = vmov 1326507024   ;;  %v607_v46 = vmov 683565275  }
   0x3   :  { %v461_v7 = vld [vmem:[%s802_s6] sm:$0xff]  ;;  %v608_v48 = vmov 2475754826   ;;  %v609_v50 = vmov 2131351028  }
   0x4   :  { %v590_v8 = vld [vmem:[%s803_s2] sm:$0xff]  }
   0x5   :  { %548 = vmatprep.mubr.msk.bf16.mxu0 %vm294_vm0, %v590_v8  ;;  %v677_v9 = vld [vmem:[%s804_s0] ss:$0 sm:$0xff] }
   0x6   :  { %54 = vperm.xlu1 %588, %v29_v3   ;;  %38 = vperm.xlu0 %587, %v29_v3  }
   0xa   :  { %66 = vperm.xlu1 %588, %v30_v4   ;;  %61 = vperm.xlu0 %587, %v30_v4  }
   0xe   :  { %370 = vperm.xlu0 %587, %v364_v5   ;;  %589 = vset.pattern.permute.xlu1 %v603_v1 }
  0x12   :  { %380 = vperm.xlu0 %587, %v366_v6  }
  0x16   :  { %464 = vperm.xlu0 %587, %v461_v7  }
  0x81   :  { %v51_v10 = vpop.permute.xlu1 %50  ;;  %v34_v11 = vpop.permute.xlu0 %33 }
  0x82   :  { %v47_v12 = vmul.f32 %v677_v9, %v34_v11 }
  0x84   :  { %v680_v13 = vadd.f32 %v51_v10, %v47_v12 }
  0x85   :  { %v39_v14 = vpop.permute.xlu0 %38  ;;  %v55_v18 = vpop.permute.xlu1 %54 }
  0x86   :  { %v73_v15 = vand.u32 2139095040, %v680_v13  ;;  %v48_v16 = vmul.f32 %v677_v9, %v39_v14  ;;  %v70_v17 = vand.u32 2147483647, %v680_v13  ;;  %vm72_vm15 = vcmp.lt.s32.totalorder %v680_v13, 0 }
  0x88   :  { %v74_v19 = vshrl.u32 %v73_v15, 23  ;;  %v685_v20 = vadd.f32 %v55_v18, %v48_v16  ;;  %v77_v23 = vand.u32 8388607, %v70_v17 }
  0x8a   :  { %v516_v21 = vadd.s32 4294967169, %v74_v19  ;;  %v177_v22 = vand.u32 2139095040, %v685_v20  ;;  %v174_v24 = vand.u32 2147483647, %v685_v20  ;;  %v78_v28 = vor.u32 8388608, %v77_v23 }
  0x8c   :  { %v80_v25 = vadd.s32 1, %v516_v21  ;;  %v178_v26 = vshrl.u32 %v177_v22, 23  ;;  %v693_v30 = vand.u32 8388607, %v174_v24  ;;  %v695_v35 = vshll.u32 %v78_v28, 8 }
  0x8e   :  { %vm81_vm1 = vcmp.gt.s32.totalorder %v80_v25, 0  ;;  %v520_v27 = vadd.s32 4294967169, %v178_v26  ;;  %v182_v40 = vor.u32 8388608, %v693_v30 }
  0x8f   :  { %v82_v29 = vsel %vm81_vm1, %v80_v25, 0  ;;  %vm757_vm1 = vcmp.le.f32.partialorder %v70_v17, 0.7853982 }
  0x90   :  { %v83_v31 = vshrl.u32 %v82_v29, 5  ;;  %v84_v32 = vand.u32 31, %v82_v29  ;;  %v184_v33 = vadd.s32 1, %v520_v27 }
  0x92   :  { %v85_v34 = vsub.s32 32, %v84_v32  ;;  %v96_v37 = vshll.u32 %v604_v36, %v84_v32  ;;  %v99_v39 = vshll.u32 %v605_v38, %v84_v32  ;;  %vm185_vm2 = vcmp.gt.s32.totalorder %v184_v33, 0 }
  0x93   :  { %vm105_vm3 = vcmp.lt.s32.totalorder %v83_v31, 4  ;;  %v186_v44 = vsel %vm185_vm2, %v184_v33, 0  ;;  %v87_v47 = vshll.u32 %v607_v46, %v84_v32  ;;  %v90_v54 = vshll.u32 %v608_v48, %v84_v32 }
  0x94   :  { %v97_v41 = vshrl.u32 %v605_v38, %v85_v34  ;;  %v100_v43 = vshrl.u32 %v606_v42, %v85_v34  ;;  %v188_v45 = vand.u32 31, %v186_v44  ;;  %v88_v49 = vshrl.u32 %v608_v48, %v85_v34 }
  0x95   :  { %v91_v51 = vshrl.u32 %v609_v50, %v85_v34  ;;  %v94_v55 = vshrl.u32 %v604_v36, %v85_v34  ;;  %v699_v56 = vshrl.u32 %v186_v44, 5  ;;  %v93_v58 = vshll.u32 %v609_v50, %v84_v32 }
  0x96   :  { %v98_v52 = vor.u32 %v97_v41, %v96_v37  ;;  %v101_v53 = vor.u32 %v100_v43, %v99_v39  ;;  %v189_v57 = vsub.s32 32, %v188_v45  ;;  %vm102_vm4 = vcmp.lt.s32.totalorder %v83_v31, 1 }
  0x97   :  { %v203_v60 = vshll.u32 %v605_v38, %v188_v45  ;;  %v89_v61 = vor.u32 %v88_v49, %v87_v47  ;;  %v92_v62 = vor.u32 %v91_v51, %v90_v54  ;;  %v95_v2 = vor.u32 %v94_v55, %v93_v58 }
  0x98   :  { %v111_v59 = vsel %vm105_vm3, %v98_v52, 920167782  ;;  %v115_v63 = vsel %vm105_vm3, %v101_v53, 1326507024  ;;  %v201_v0 = vshrl.u32 %v605_v38, %v189_v57  ;;  %v204_v1 = vshrl.u32 %v606_v42, %v189_v57 }
  0x99   :  { %v200_v3 = vshll.u32 %v604_v36, %v188_v45  ;;  %v86_v4 = vshrl.u32 %v607_v46, %v85_v34  ;;  %vm104_vm5 = vcmp.lt.s32.totalorder %v83_v31, 3  ;;  %v110_v5 = vsel %vm102_vm4, %v89_v61, %v92_v62 }
  0x9a   :  { %v205_v6 = vor.u32 %v204_v1, %v203_v60  ;;  %vm103_vm6 = vcmp.lt.s32.totalorder %v83_v31, 2  ;;  %v107_v7 = vsel %vm105_vm3, %v95_v2, 2102212464  ;;  %v112_v8 = vsel %vm104_vm5, %v95_v2, %v111_v59 }
  0x9b   :  { %vm209_vm7 = vcmp.lt.s32.totalorder %v699_v56, 4  ;;  %v113_v10 = vsel %vm103_vm6, %v110_v5, %v112_v8  ;;  %v114_v11 = vsel %vm102_vm4, %v92_v62, %v95_v2  ;;  %v116_v12 = vsel %vm104_vm5, %v98_v52, %v115_v63 }
  0x9c   :  { %v202_v14 = vor.u32 %v201_v0, %v200_v3  ;;  %v106_v15 = vsel %vm102_vm4, %v86_v4, %v89_v61  ;;  %v108_v16 = vsel %vm104_vm5, %v92_v62, %v107_v7  ;;  %v117_v18 = vsel %vm103_vm6, %v114_v11, %v116_v12 }
  0x9d   :  { %v712_v19 = vmul.u32.u64.low %v695_v35, %v117_v18  ;;  %v713_v21 = vmul.u32.u64.high %v695_v35, %v117_v18, %v712_v19  ;;  %v716_v22 = vmul.u32.u64.low %v695_v35, %v113_v10  ;;  %v717_v23 = vmul.u32.u64.high %v695_v35, %v113_v10, %v716_v22 }
  0x9e   :  { %v219_v25 = vsel %vm209_vm7, %v205_v6, 1326507024  ;;  %v191_v26 = vshll.u32 %v607_v46, %v188_v45  ;;  %v192_v27 = vshrl.u32 %v608_v48, %v189_v57  ;;  %v109_v28 = vsel %vm103_vm6, %v106_v15, %v108_v16 }
  0x9f   :  { %v194_v29 = vshll.u32 %v608_v48, %v188_v45  ;;  %v195_v30 = vshrl.u32 %v609_v50, %v189_v57  ;;  %v198_v32 = vshrl.u32 %v604_v36, %v189_v57  ;;  %v215_v33 = vsel %vm209_vm7, %v202_v14, 920167782 }
  0xa0   :  { %v193_v34 = vor.u32 %v192_v27, %v191_v26  ;;  %v197_v37 = vshll.u32 %v609_v50, %v188_v45  ;;  %v222_v38 = vshll.u32 %v182_v40, 8  ;;  %vm127_vm8 = vc.u32 %v713_v21, %v716_v22 }
  0xa1   :  { %v128_v39 = vadd.s32 1, %v717_v23  ;;  %v196_v41 = vor.u32 %v195_v30, %v194_v29  ;;  %vm208_vm9 = vcmp.lt.s32.totalorder %v699_v56, 3  ;;  %v125_v42 = vmul.u32 %v695_v35, %v109_v28 }
  0xa2   :  { %v199_v31 = vor.u32 %v198_v32, %v197_v37  ;;  %vm206_vm10 = vcmp.lt.s32.totalorder %v699_v56, 1  ;;  %v220_v36 = vsel %vm208_vm9, %v202_v14, %v219_v25  ;;  %v190_v44 = vshrl.u32 %v607_v46, %v189_v57 }
  0xa3   :  { %v129_v43 = vsel %vm127_vm8, %v128_v39, %v717_v23  ;;  %vm207_vm11 = vcmp.lt.s32.totalorder %v699_v56, 2  ;;  %v214_v40 = vsel %vm206_vm10, %v193_v34, %v196_v41  ;;  %v126_v11 = vadd.s32 %v716_v22, %v713_v21 }
  0xa4   :  { %v130_v45 = vadd.s32 %v129_v43, %v125_v42  ;;  %v211_v47 = vsel %vm209_vm7, %v199_v31, 2102212464  ;;  %v216_v35 = vsel %vm208_vm9, %v199_v31, %v215_v33  ;;  %v218_v48 = vsel %vm206_vm10, %v196_v41, %v199_v31 }
  0xa5   :  { %v210_v49 = vsel %vm206_vm10, %v190_v44, %v193_v34  ;;  %v217_v50 = vsel %vm207_vm11, %v214_v40, %v216_v35  ;;  %v221_v51 = vsel %vm207_vm11, %v218_v48, %v220_v36  ;;  %v212_v53 = vsel %vm208_vm9, %v196_v41, %v211_v47 }
  0xa6   :  { %v131_v52 = vadd.s32 536870912, %v130_v45  ;;  %v741_v54 = vmul.u32.u64.low %v222_v38, %v221_v51  ;;  %v742_v46 = vmul.u32.u64.high %v222_v38, %v221_v51, %v741_v54  ;;  %v213_v59 = vsel %vm207_vm11, %v210_v49, %v212_v53 }
  0xa7   :  { %v744_v55 = vmul.u32.u64.low %v222_v38, %v217_v50  ;;  %v745_v57 = vmul.u32.u64.high %v222_v38, %v217_v50, %v744_v55  ;;  %v229_v63 = vmul.u32 %v222_v38, %v213_v59  ;;  %vm176_vm2 = vcmp.lt.s32.totalorder %v685_v20, 0 }
  0xa8   :  { %v132_v58 = vshrl.u32 %v131_v52, 30  ;;  %vm175_vm3 = vcmp.le.f32.partialorder %v174_v24, 0.7853982  ;;  %vm162_vm10 = vweird.f32 %v680_v13  ;;  %vm266_vm11 = vweird.f32 %v685_v20 }
  0xa9   :  { %vm231_vm12 = vc.u32 %v742_v46, %v744_v55  ;;  %v232_v61 = vadd.s32 1, %v745_v57  ;;  %v230_v37 = vadd.s32 %v744_v55, %v742_v46 }
  0xaa   :  { %v133_v60 = vshll.u32 %v132_v58, 30  ;;  %v156_v47 = vsub.s32 4, %v132_v58 }
  0xab   :  { %v233_v0 = vsel %vm231_vm12, %v232_v61, %v745_v57  ;;  %vm301_vm12 = vcmask 1043456  }
  0xac   :  { %v134_v62 = vsub.s32 %v130_v45, %v133_v60  ;;  %v234_v56 = vadd.s32 %v233_v0, %v229_v63  ;;  %v157_v17 = vsel %vm72_vm15, %v156_v47, %v132_v58  ;;  %v62_v0 = vpop.permute.xlu0 %61 }
  0xad   :  { %v159_v52 = vsel %vm757_vm1, 0, %v157_v17 }
  0xae   :  { %v136_v1 = vsub.s32 0, %v134_v62  ;;  %v235_v3 = vadd.s32 536870912, %v234_v56  ;;  %v163_v55 = vadd.s32 3, %v159_v52 }
  0xb0   :  { %v517_v2 = vmin.u32 %v136_v1, %v134_v62  ;;  %v236_v5 = vshrl.u32 %v235_v3, 30  ;;  %v164_v61 = vand.u32 3, %v163_v55 }
  0xb2   :  { %v138_v4 = vclz %v517_v2  ;;  %v237_v7 = vshll.u32 %v236_v5, 30  ;;  %v260_v50 = vsub.s32 4, %v236_v5  ;;  %vm166_vm4 = vcmp.eq.s32.totalorder %v164_v61, 0 }
  0xb3   :  { %vm169_vm5 = vcmp.eq.s32.totalorder %v164_v61, 2  ;;  %vm165_vm6 = vcmp.lt.s32.totalorder %v164_v61, 2 }
  0xb4   :  { %v518_v6 = vadd.s32 4294967294, %v138_v4  ;;  %v238_v10 = vsub.s32 %v234_v56, %v237_v7  ;;  %v261_v54 = vsel %vm176_vm2, %v260_v50, %v236_v5  ;;  %v64_v4 = vmul.f32 %v677_v9, %v62_v0 }
  0xb5   :  { %v263_v57 = vsel %vm175_vm3, 0, %v261_v54  ;;  %v458_v54 = vld [vmem:[%s806_s5] sm:$0xf] }
  0xb6   :  { %vm519_vm13 = vcmp.lt.s32.totalorder %v518_v6, 0  ;;  %v240_v15 = vsub.s32 0, %v238_v10  ;;  %v267_v58 = vadd.s32 3, %v263_v57 }
  0xb7   :  { %v141_v8 = vsel %vm519_vm13, 0, %v518_v6  ;;  %vm398_vm13 = vcmask 261120  }
  0xb8   :  { %v142_v12 = vsub.s32 32, %v141_v8  ;;  %v146_v14 = vsub.s32 4294967266, %v141_v8  ;;  %v143_v16 = vshll.u32 %v134_v62, %v141_v8  ;;  %v521_v23 = vmin.u32 %v240_v15, %v238_v10 }
  0xb9   :  { %v268_v1 = vand.u32 3, %v267_v58 }
  0xba   :  { %v144_v18 = vshrl.u32 %v126_v11, %v142_v12  ;;  %v147_v19 = vadd.s32 127, %v146_v14  ;;  %v242_v27 = vclz %v521_v23  ;;  %v591_v23 = vld [vmem:[%s803_s2 + $0x8] sm:$0xff]  }
  0xbb   :  { %vm273_vm7 = vcmp.eq.s32.totalorder %v268_v1, 2  ;;  %vm270_vm8 = vcmp.eq.s32.totalorder %v268_v1, 0  ;;  %vm269_vm9 = vcmp.lt.s32.totalorder %v268_v1, 2 }
  0xbc   :  { %v145_v25 = vor.u32 %v144_v18, %v143_v16  ;;  %v148_v26 = vshll.u32 %v147_v19, 23  ;;  %v522_v29 = vadd.s32 4294967294, %v242_v27 }
  0xbe   :  { %v149_v28 = vor.u32 4788187, %v148_v26  ;;  %v152_v32 = vcvt.s32.f32 %v145_v25  ;;  %vm523_vm14 = vcmp.lt.s32.totalorder %v522_v29, 0  ;;  %v367_v25 = vld [vmem:[%s801_s4 + $0x18] sm:$0xff] }
  0xbf   :  { %v245_v34 = vsel %vm523_vm14, 0, %v522_v29 }
  0xc0   :  { %v150_v30 = vand.u32 2147483647, %v149_v28  ;;  %v246_v21 = vsub.s32 32, %v245_v34  ;;  %v250_v22 = vsub.s32 4294967266, %v245_v34  ;;  %v247_v39 = vshll.u32 %v238_v10, %v245_v34  ;;  %v67_v10 = vpop.permute.xlu1 %66 }
  0xc1   :  { %v69_v12 = vadd.f32 %v67_v10, %v64_v4 }
  0xc2   :  { %v153_v33 = vmul.f32 %v152_v32, %v150_v30  ;;  %v248_v41 = vshrl.u32 %v230_v37, %v246_v21  ;;  %v251_v42 = vadd.s32 127, %v250_v22  ;;  %v593_v22 = vld [vmem:[%s805_s3 + $0x8] sm:$0xff]  }
  0xc3   :  { %v279_v9 = vpack.c.bf16 %v69_v12, %v69_v12 }
  0xc4   :  { %v154_v38 = vxor.u32 2147483648, %v153_v33  ;;  %v249_v43 = vor.u32 %v248_v41, %v247_v39  ;;  %v252_v44 = vshll.u32 %v251_v42, 23  ;;  %v371_v39 = vpop.permute.xlu0 %370 }
  0xc5   :  { %v303_v19 = vsel %vm301_vm12, %v279_v9, 0 }
  0xc6   :  { %v155_v31 = vsel %vm72_vm15, %v154_v38, %v153_v33  ;;  %v253_v45 = vor.u32 4788187, %v252_v44  ;;  %v256_v48 = vcvt.s32.f32 %v249_v43  ;;  %v610_v38 = vmov 0.0  }
  0xc7   :  { %v158_v40 = vsel %vm757_vm1, %v680_v13, %v155_v31  ;;  %v592_v13 = vld [vmem:[%s805_s3] sm:$0xff]  }
  0xc8   :  { %594 = vcosq.f32 %v158_v40  ;;  %v254_v35 = vand.u32 2147483647, %v253_v45  ;;  %556 = vmatprep.mubr.msk.bf16.mxu1 %vm398_vm13, %v592_v13  ;;  %v381_v42 = vpop.permute.xlu0 %380 }
  0xc9   :  { %596 = vsinq.f32 %v158_v40 }
  0xca   :  { %v257_v49 = vmul.f32 %v256_v48, %v254_v35 }
  0xcc   :  { %v258_v51 = vxor.u32 2147483648, %v257_v49 }
  0xce   :  { %v259_v53 = vsel %vm176_vm2, %v258_v51, %v257_v49 }
  0xcf   :  { %v262_v46 = vsel %vm175_vm3, %v685_v20, %v259_v53  ;;  %v365_v20 = vld [vmem:[%s801_s4 + $0x8] sm:$0xff] }
  0xd0   :  { %598 = vcosq.f32 %v262_v46  ;;  %375 = vperm.xlu1 %589, %v365_v20  }
  0xd1   :  { %600 = vsinq.f32 %v262_v46  ;;  %v465_v46 = vpop.permute.xlu0 %464 }
  0xd2   :  { %v595_v59 = vpop.eup %594 }
  0xd3   :  { %v597_v60 = vpop.eup %596  ;;  %v170_v63 = vxor.u32 2147483648, %v595_v59 }
  0xd4   :  { %v167_v62 = vxor.u32 2147483648, %v597_v60  ;;  %385 = vperm.xlu1 %589, %v367_v25  }
  0xd5   :  { %v171_v2 = vsel %vm169_vm5, %v170_v63, %v597_v60 }
  0xd6   :  { %v168_v24 = vsel %vm166_vm4, %v595_v59, %v167_v62 }
  0xd7   :  { %v172_v7 = vsel %vm165_vm6, %v168_v24, %v171_v2 }
  0xd8   :  { %v173_v15 = vsel %vm162_vm10, nan, %v172_v7 }
  0xda   :  { %v599_v56 = vpop.eup %598 }
  0xdb   :  { %v601_v3 = vpop.eup %600  ;;  %v274_v5 = vxor.u32 2147483648, %v599_v56 }
  0xdc   :  { %v271_v6 = vxor.u32 2147483648, %v601_v3 }
  0xdd   :  { %v275_v8 = vsel %vm273_vm7, %v274_v5, %v601_v3 }
  0xde   :  { %v272_v11 = vsel %vm270_vm8, %v599_v56, %v271_v6 }
  0xdf   :  { %v276_v14 = vsel %vm269_vm9, %v272_v11, %v275_v8 }
  0xe0   :  { %v277_v16 = vsel %vm266_vm11, nan, %v276_v14 }
  0xe1   :  { %v278_v18 = vpack.c.bf16 %v277_v16, %v173_v15 }
  0xe3   :  { %544 = vmatprep.subr.bf16.mxu0 %v278_v18 }
  0xe4   :  { %545 = vmatpush3.bf16.msra.mxu0 %v278_v18 }
  0xe5   :  { %568 = vmatprep.subr.msk.bf16.mxu0 %vm301_vm12, %v279_v9 }
  0xe8   :  { %547 = vmatpush3.bf16.msra.mxu0 %v303_v19 }
  0xe9   :  { %560 = vmatprep.subr.bf16.mxu0 %v610_v38 }
  0xeb   :  { %549 = vmatmul.mubr.msk.bf16.vlgmr.msra.gmra.mrb[0].mxu0 %vm294_vm0, %v591_v23  ;;  %vm611_vm0 = vmmov 0  }
  0xec   :  { %564 = vmatprep.mubr.msk.bf16.mxu0 %vm611_vm0, %v610_v38 }
 0x14f   :  { %v376_v41 = vpop.permute.xlu1 %375 }
 0x153   :  { %v386_v36 = vpop.permute.xlu1 %385 }
 0x1be   :  { %v550_v26 = vpop.f32.mrb[0].mxu0 }
 0x1bf   :  { %v339_v27 = vpop.f32.mrb[1].mxu0  ;;  %v356_v29 = vmax.f32 %v550_v26, 0.0 }
 0x1c0   :  { %v551_v28 = vpop.f32.mrb[2].mxu0  ;;  %v354_v33 = vmax.f32 %v339_v27, 0.0 }
 0x1c1   :  { %v357_v30 = vmax.f32 %v551_v28, 0.0  ;;  %v342_v32 = vpop.f32.mrb[3].mxu0 }
 0x1c2   :  { %v355_v34 = vmax.f32 %v342_v32, 0.0 }
 0x1c3   :  { %v363_v37 = vpack.c.bf16 %v357_v30, %v356_v29 }
 0x1c4   :  { %v362_v21 = vpack.c.bf16 %v355_v34, %v354_v33 }
 0x1c6   :  { %552 = vmatprep.subr.bf16.mxu1 %v362_v21 }
 0x1c7   :  { %553 = vmatpush3.bf16.msra.mxu1 %v362_v21 }
 0x1c8   :  { %554 = vmatprep.subr.bf16.mxu1 %v363_v37 }
 0x1cb   :  { %555 = vmatpush3.bf16.msra.mxu1 %v363_v37 }
 0x1ce   :  { %557 = vmatmul.mubr.msk.bf16.vlgmr.msra.gmra.mrb[0].mxu1 %vm398_vm13, %v593_v22 }
 0x2a1   :  { %v558_v31 = vpop.f32.mrb[0].mxu1 }
 0x2a2   :  { %v448_v43 = vadd.f32 %v558_v31, %v381_v42  ;;  %v439_v44 = vpop.f32.mrb[1].mxu1 }
 0x2a3   :  { %v440_v40 = vadd.f32 %v439_v44, %v371_v39  ;;  %v559_v45 = vpop.f32.mrb[2].mxu1 }
 0x2a4   :  { %v451_v47 = vadd.f32 %v559_v45, %v386_v36  ;;  %v442_v35 = vpop.f32.mrb[3].mxu1  ;;  %v456_v49 = vmax.f32 %v448_v43, 0.0 }
 0x2a5   :  { %v443_v48 = vadd.f32 %v442_v35, %v376_v41  ;;  %v454_v17 = vmax.f32 %v440_v40, 0.0 }
 0x2a6   :  { %v457_v50 = vmax.f32 %v451_v47, 0.0 }
 0x2a7   :  { %v455_v51 = vmax.f32 %v443_v48, 0.0 }
 0x2a8   :  { %v460_v52 = vpack.c.bf16 %v457_v50, %v456_v49 }
 0x2a9   :  { %v459_v53 = vpack.c.bf16 %v455_v51, %v454_v17 }
 0x2ab   :  { %561 = vmatpush3.bf16.msra.mxu0 %v459_v53 }
 0x2ac   :  { %562 = vmatprep.subr.bf16.mxu0 %v610_v38 }
 0x2af   :  { %563 = vmatpush3.bf16.msra.mxu0 %v460_v52 }
 0x2b2   :  { %565 = vmatmul.mubr.msk.bf16.vlgmr.msra.gmra.mrb[4].mxu0 %vm398_vm13, %v458_v54 }
 0x385   :  { %v504_v55 = vpop.f32.mrb[4].mxu0 }
 0x386   :  { %v505_v57 = vadd.f32 %v504_v55, %v465_v46  ;;  %v566_v59 = vpop.f32.mrb[5].mxu0 }
 0x387   :  { %v507_v60 = vpop.f32.mrb[6].mxu0 }
 0x388   :  { %510 = vst [vmem:[%s807_s7] sm:$0xff] %v505_v57  ;;  %v567_v58 = vpop.f32.mrb[7].mxu0 }

</bundles_post_ra>
